<compile_context>
chip_gen: v6e
topology: v6e:2x2x1
jax: 0.10.0
libtpu: 0.0.40
codegen_flags: <defaults>
</compile_context>

<pallas_src>
import jax
import jax.numpy as jnp
from jax.experimental import pallas as pl
from jax.experimental.pallas import tpu as pltpu

EPS = 1e-5
THRESH = 1.0

_TARGET_BLOCK_BYTES = 2 * 1024 * 1024     # raw (un-padded) bytes per input block
_MIN_VMEM_LIMIT = 32 * 1024 * 1024        # explicit scoped-VMEM request


# --------------------------------------------------------------------------
# Kernels
# --------------------------------------------------------------------------
def _stats_kernel(x_ref, sum_ref, sq_ref):
    """Accumulate per-channel sum / sum-of-squares over the hw grid axis."""
    @pl.when(pl.program_id(1) == 0)
    def _():
        sum_ref[...] = jnp.zeros_like(sum_ref)
        sq_ref[...] = jnp.zeros_like(sq_ref)

    x = x_ref[...].astype(jnp.float32)              # (tb_tile, C, hw_tile)
    sum_ref[...] += jnp.sum(x, axis=(0, 2))[None, None, :]
    sq_ref[...] += jnp.sum(x * x, axis=(0, 2))[None, None, :]


def _normalize_kernel(x_ref, scale_ref, shift_ref, o_ref):
    """y = x * scale[c] + shift[c]  (scale/shift fold mean, var, gamma, beta)."""
    scale = scale_ref[...]                          # (1, C, 1)
    shift = shift_ref[...]
    y = x_ref[...].astype(scale.dtype) * scale + shift
    o_ref[...] = y.astype(o_ref.dtype)


# --------------------------------------------------------------------------
# Tile selection
# --------------------------------------------------------------------------
def _largest_divisor_leq(n, cap):
    cap = int(max(1, min(n, cap)))
    for d in range(cap, 0, -1):
        if n % d == 0:
            return d
    return 1


def _pick_tiles(tb, c, hw, itemsize):
    """Pick (tb_tile, hw_tile) as exact divisors under the VMEM block budget."""
    row_bytes = c * hw * itemsize                   # one (1, C, HW) slab
    if row_bytes <= _TARGET_BLOCK_BYTES:
        hw_tile = hw
        tb_tile = _largest_divisor_leq(tb, _TARGET_BLOCK_BYTES // row_bytes)
        # Keep >=2 tiles along the parallel axis when possible so the stats
        # pass can split across the two TensorCores on v7x; the extra grid
        # step (~0.35 us) is negligible on single-TC v5e/v6e.
        if tb_tile == tb and tb > 1:
            tb_tile = _largest_divisor_leq(tb, tb // 2)
    else:
        tb_tile = 1
        # Last block dim must be a multiple of 128 (or the full dim hw).
        cap = max(128, (_TARGET_BLOCK_BYTES // (c * itemsize)) // 128 * 128)
        hw_tile = 0
        d = cap
        while d >= 128:
            if hw % d == 0:
                hw_tile = d
                break
            d -= 128
        if hw_tile == 0:
            hw_tile = hw    # no 128-multiple divisor; take full rows
    return tb_tile, hw_tile


# --------------------------------------------------------------------------
# Wrapper
# --------------------------------------------------------------------------
def batch_norm_2d1_pallas(x, gamma, beta, *, eps=EPS):
    """x: (T, B, C, H, W); gamma/beta: (C,).  Returns same shape/dtype as x."""
    T, B, C, H, W = x.shape
    TB, HW = T * B, H * W
    M = TB * HW
    itemsize = x.dtype.itemsize

    # Free reshape (merges adjacent contiguous dims) -- no HBM transpose.
    xv = x.reshape(TB, C, HW)

    tb_tile, hw_tile = _pick_tiles(TB, C, HW, itemsize)
    n_tb, n_hw = TB // tb_tile, HW // hw_tile

    padded_c = -(-C // 8) * 8                       # sublane padding when C < 8
    block_bytes = tb_tile * padded_c * hw_tile * itemsize
    vmem_limit = int(max(_MIN_VMEM_LIMIT, 5 * block_bytes))

    # ---- pass 1: per-channel partial sums / sums-of-squares ----------------
    psum, psq = pl.pallas_call(
        _stats_kernel,
        out_shape=(jax.ShapeDtypeStruct((n_tb, 1, C), jnp.float32),
                   jax.ShapeDtypeStruct((n_tb, 1, C), jnp.float32)),
        grid=(n_tb, n_hw),
        in_specs=[pl.BlockSpec((tb_tile, C, hw_tile), lambda i, j: (i, 0, j))],
        out_specs=(pl.BlockSpec((1, 1, C), lambda i, j: (i, 0, 0)),
                   pl.BlockSpec((1, 1, C), lambda i, j: (i, 0, 0))),
        compiler_params=pltpu.CompilerParams(
            dimension_semantics=("parallel", "arbitrary"),
            vmem_limit_bytes=vmem_limit),
    )(xv)

    # ---- tiny per-channel epilogue (C elements) in plain XLA ---------------
    ssum = jnp.sum(psum, axis=(0, 1))
    ssq = jnp.sum(psq, axis=(0, 1))
    mean = ssum / M
    var = jnp.maximum(ssq / M - mean * mean, 0.0)   # biased var; clamp cancellation
    scale = gamma.astype(jnp.float32) * jax.lax.rsqrt(var + eps)
    shift = beta.astype(jnp.float32) - mean * scale

    compute_dtype = x.dtype if x.dtype == jnp.bfloat16 else jnp.float32
    scale = scale.reshape(1, C, 1).astype(compute_dtype)
    shift = shift.reshape(1, C, 1).astype(compute_dtype)

    # ---- pass 2: y = x * scale + shift --------------------------------------
    y = pl.pallas_call(
        _normalize_kernel,
        out_shape=jax.ShapeDtypeStruct((TB, C, HW), x.dtype),
        grid=(n_tb, n_hw),
        in_specs=[pl.BlockSpec((tb_tile, C, hw_tile), lambda i, j: (i, 0, j)),
                  pl.BlockSpec((1, C, 1), lambda i, j: (0, 0, 0)),
                  pl.BlockSpec((1, C, 1), lambda i, j: (0, 0, 0))],
        out_specs=pl.BlockSpec((tb_tile, C, hw_tile), lambda i, j: (i, 0, j)),
        compiler_params=pltpu.CompilerParams(
            dimension_semantics=("parallel", "parallel"),
            vmem_limit_bytes=vmem_limit),
    )(xv, scale, shift)

    return y.reshape(T, B, C, H, W)


# --------------------------------------------------------------------------
# Reference + test
# --------------------------------------------------------------------------
def batch_norm_2d1_ref(x, gamma, beta, *, eps=EPS):
    xf = x.astype(jnp.float32)
    mean = jnp.mean(xf, axis=(0, 1, 3, 4), keepdims=True)
    var = jnp.var(xf, axis=(0, 1, 3, 4), keepdims=True)  # biased
    g = gamma.reshape(1, 1, -1, 1, 1)
    b = beta.reshape(1, 1, -1, 1, 1)
    return ((xf - mean) * jax.lax.rsqrt(var + eps) * g + b).astype(x.dtype)


if __name__ == "__main__":
    # Small shapes: (T, B, C, H, W); num_features = C.
    T, B, C, H, W = 2, 2, 4, 8, 8
    key = jax.random.PRNGKey(0)
    x = jax.random.normal(key, (T, B, C, H, W), dtype=jnp.float32)

    # Parameters per BatchNorm3d2.reset_parameters: weight = 0.2*thresh, bias = 0.
    gamma = jnp.full((C,), 0.2 * THRESH, dtype=jnp.float32)
    beta = jnp.zeros((C,), dtype=jnp.float32)

    out = batch_norm_2d1_pallas(x, gamma, beta)
    out = jax.block_until_ready(out)

    ref = batch_norm_2d1_ref(x, gamma, beta)
    assert out.shape == x.shape and out.dtype == x.dtype
    assert jnp.max(jnp.abs(out - ref)) < 1e-4, "mismatch vs reference"

    # TODO(synk): running_mean/running_var updates (training-state side effects
    # of BatchNorm3d) are not modeled; only the training-mode forward output is
    # reproduced.
    print("KERNEL_OK")
</pallas_src>

<mosaic_0001>
module attributes {stable_mosaic.version = 11 : i64} {
  func.func @_stats_kernel(%arg0: i32, %arg1: i32, %arg2: memref<2x4x64xf32, #tpu.memory_space<vmem>>, %arg3: memref<1x1x4xf32, #tpu.memory_space<vmem>>, %arg4: memref<1x1x4xf32, #tpu.memory_space<vmem>>) attributes {dimension_semantics = [#tpu.dimension_semantics<parallel>, #tpu.dimension_semantics<arbitrary>], iteration_bounds = array<i64: 2, 1>, scalar_prefetch = 0 : i64, scratch_operands = 0 : i64, tpu.core_type = #tpu.core_type<tc>, window_params = [{transform_indices = @transform_0, window_bounds = array<i64: 2, 4, 64>}, {transform_indices = @transform_1, window_bounds = array<i64: 1, 1, 4>}, {transform_indices = @transform_2, window_bounds = array<i64: 1, 1, 4>}]} {
    %c0_i32 = arith.constant 0 : i32
    %0 = arith.cmpi eq, %arg1, %c0_i32 : i32
    %1 = arith.extui %0 : i1 to i32
    %c0_i32_0 = arith.constant 0 : i32
    %2 = arith.cmpi ne, %1, %c0_i32_0 : i32
    scf.if %2 {
      %cst_16 = arith.constant 0.000000e+00 : f32
      %15 = vector.broadcast %cst_16 : f32 to vector<1x1x4xf32>
      %c0_17 = arith.constant 0 : index
      %c0_18 = arith.constant 0 : index
      %c0_19 = arith.constant 0 : index
      %16 = vector.load %arg3[%c0_17, %c0_18, %c0_19] : memref<1x1x4xf32, #tpu.memory_space<vmem>>, vector<1x1x4xf32>
      tpu.vector_store %arg3[%c0_17, %c0_18, %c0_19], %15 {strides = array<i32>} : memref<1x1x4xf32, #tpu.memory_space<vmem>>, vector<1x1x4xf32>,
      %cst_20 = arith.constant 0.000000e+00 : f32
      %17 = vector.broadcast %cst_20 : f32 to vector<1x1x4xf32>
      %c0_21 = arith.constant 0 : index
      %c0_22 = arith.constant 0 : index
      %c0_23 = arith.constant 0 : index
      %18 = vector.load %arg4[%c0_21, %c0_22, %c0_23] : memref<1x1x4xf32, #tpu.memory_space<vmem>>, vector<1x1x4xf32>
      tpu.vector_store %arg4[%c0_21, %c0_22, %c0_23], %17 {strides = array<i32>} : memref<1x1x4xf32, #tpu.memory_space<vmem>>, vector<1x1x4xf32>,
    } else {
    }
    %c0 = arith.constant 0 : index
    %c0_1 = arith.constant 0 : index
    %c0_2 = arith.constant 0 : index
    %3 = vector.load %arg2[%c0, %c0_1, %c0_2] : memref<2x4x64xf32, #tpu.memory_space<vmem>>, vector<2x4x64xf32>
    %c0_3 = arith.constant 0 : index
    %c0_4 = arith.constant 0 : index
    %c0_5 = arith.constant 0 : index
    %4 = vector.load %arg3[%c0_3, %c0_4, %c0_5] : memref<1x1x4xf32, #tpu.memory_space<vmem>>, vector<1x1x4xf32>
    %cst = arith.constant dense<0.000000e+00> : vector<4xf32>
    %5 = vector.multi_reduction <add>, %3, %cst [0, 2] : vector<2x4x64xf32> to vector<4xf32>
    %6 = vector.shape_cast %5 : vector<4xf32> to vector<1x1x4xf32>
    %7 = arith.addf %4, %6 : vector<1x1x4xf32>
    %c0_6 = arith.constant 0 : index
    %c0_7 = arith.constant 0 : index
    %c0_8 = arith.constant 0 : index
    %8 = vector.load %arg3[%c0_6, %c0_7, %c0_8] : memref<1x1x4xf32, #tpu.memory_space<vmem>>, vector<1x1x4xf32>
    tpu.vector_store %arg3[%c0_6, %c0_7, %c0_8], %7 {strides = array<i32>} : memref<1x1x4xf32, #tpu.memory_space<vmem>>, vector<1x1x4xf32>,
    %c0_9 = arith.constant 0 : index
    %c0_10 = arith.constant 0 : index
    %c0_11 = arith.constant 0 : index
    %9 = vector.load %arg4[%c0_9, %c0_10, %c0_11] : memref<1x1x4xf32, #tpu.memory_space<vmem>>, vector<1x1x4xf32>
    %10 = arith.mulf %3, %3 : vector<2x4x64xf32>
    %cst_12 = arith.constant dense<0.000000e+00> : vector<4xf32>
    %11 = vector.multi_reduction <add>, %10, %cst_12 [0, 2] : vector<2x4x64xf32> to vector<4xf32>
    %12 = vector.shape_cast %11 : vector<4xf32> to vector<1x1x4xf32>
    %13 = arith.addf %9, %12 : vector<1x1x4xf32>
    %c0_13 = arith.constant 0 : index
    %c0_14 = arith.constant 0 : index
    %c0_15 = arith.constant 0 : index
    %14 = vector.load %arg4[%c0_13, %c0_14, %c0_15] : memref<1x1x4xf32, #tpu.memory_space<vmem>>, vector<1x1x4xf32>
    tpu.vector_store %arg4[%c0_13, %c0_14, %c0_15], %13 {strides = array<i32>} : memref<1x1x4xf32, #tpu.memory_space<vmem>>, vector<1x1x4xf32>,
    return
  }
  func.func @transform_0(%arg0: i32, %arg1: i32) -> (i32, i32, i32) {
    %c0_i32 = arith.constant 0 : i32
    %c0_i32_0 = arith.constant 0 : i32
    return %arg0, %c0_i32, %arg1 : i32, i32, i32
  }
  func.func @transform_1(%arg0: i32, %arg1: i32) -> (i32, i32, i32) {
    %c0_i32 = arith.constant 0 : i32
    %c0_i32_0 = arith.constant 0 : i32
    %c0_i32_1 = arith.constant 0 : i32
    return %arg0, %c0_i32, %c0_i32_0 : i32, i32, i32
  }
  func.func @transform_2(%arg0: i32, %arg1: i32) -> (i32, i32, i32) {
    %c0_i32 = arith.constant 0 : i32
    %c0_i32_0 = arith.constant 0 : i32
    %c0_i32_1 = arith.constant 0 : i32
    return %arg0, %c0_i32, %c0_i32_0 : i32, i32, i32
  }
}

</mosaic_0001>

<bundles_post_ra>
// kernel: tpu_custom_call.1
= control target key start
LH: loop header
LB: loop body
LE: loop exit
PB: predicated region body
PF: predicated region fallthrough
CT: control target
= control target key end

     0   :  { %8 = vsyncpa [#allocation3], 0  ;;  %s925_s0 = inlined_call_operand.hbm [shape: f32[4,4,64], index: 0, kind: input, shape index: {}]   ;;  %s926_s1 = inlined_call_operand.hbm [shape: f32[2,1,4], index: 1, kind: output, shape index: {0}]   ;;  %s927_s2 = inlined_call_operand.hbm [shape: f32[2,1,4], index: 2, kind: output, shape index: {1}]  }
   0x1   :  { %10 = vsyncpa [#allocation3 + $0x1], 0 }
   0x2   :  { %11 = vsyncpa [#allocation4], 0 }
   0x3   :  { %13 = vsyncpa [#allocation4 + $0x1], 0 }
   0x4   :  { %14 = vsyncpa [#allocation7], 0 }
   0x5   :  { %16 = vsyncpa [#allocation7 + $0x1], 0  ;;  %s729_s9 = smov 0   ;;  %s731_s10 = smov 0  }
   0x6   :  { %s733_s11 = smov 0   ;;  %s735_s12 = smov 0  }
   0x7   :  { %s737_s13 = smov 0   ;;  %s739_s14 = smov 0  }
   0x8 LB: > { %s478_s15 = sadd.s32 4294967295, %s704_s14   ;;  %s479_s16 = sadd.s32 4294967294, %s704_s14   ;;  %s704_s14 = sphi %s739_s14, %s22_s14   ;;  %s700_s13 = sphi %s737_s13, %s938_s13   ;;  %s696_s12 = sphi %s735_s12, %s937_s12   ;;  %s692_s11 = sphi %s733_s11, %s936_s11   ;;  %s688_s10 = sphi %s731_s10, %s935_s10   ;;  %s684_s9 = sphi %s729_s9, %s934_s9  }
   0x9   : > { %s34_s17 = sadd.s32 1, %s700_s13  ;;  %s43_s18 = sadd.s32 1, %s692_s11 }
   0xa   : > { %p36_p0 = scmp.ge.s32.totalorder %s34_s17, 2  ;;  %p50_p1 = scmp.ne.s32.totalorder %s692_s11, %s688_s10 }
   0xb   : > { %p51_p2 = scmp.eq.s32.totalorder %s704_s14, 0  ;;  %p56_p3 = scmp.ne.s32.totalorder %s688_s10, %s684_s9 }
   0xc   : > { %s940_s17 = smov (%p36_p0, %s34_s17), 0  ;;  %p57_p5 = scmp.eq.s32.totalorder %s478_s15, 0 }
   0xd   : > { %p770_p4 = por %p51_p2, %p50_p1  ;;  %s38_s20 = ssub.s32 %s700_s13, %s940_s17 }
   0xe   : > { %p80_p6 = scmp.eq.s32.totalorder %s478_s15, 1  ;;  %p41_p7 = scmp.eq.s32.totalorder %s38_s20, 0 }
   0xf   : > { %p776_p8 = por %p57_p5, %p56_p3  ;;  %p86_p10 = scmp.eq.s32.totalorder %s479_s16, 1 }
  0x10   : > { %p780_p9 = por %p80_p6, %p50_p1  ;;  %p509_p13 = scmp.lt.s32.totalorder %s704_s14, 2 }
  0x11   : > { %s785_s23 = scalar_select %p41_p7, %s692_s11, %s43_s18  }
  0x12   : > { %p787_p11 = por %p86_p10, %p56_p3  ;;  %s132_s25 = sand.u32 1, %s692_s11  }
  0x13   : > { %s482_s26 = sshll.u32 %s132_s25, 3  ;;  %s491_s27 = sshll.u32 %s700_s13, 7 }
  0x14   : > { %s143_s30 = scalar_lea.hbm %s925_s0, %s491_s27  ;;  %s136_s3 = scalar_lea.vmem [#allocation2], %s482_s26 }
  0x15   : > { %s144_s4 = sshll.u32 %s136_s3, 4  ;;  %p800_p0 = pnand %p509_p13, %p770_p4  ;;  %s145_s4 = int_to_ptr.vmem [resolvable:$true] %s144_s4 }
  0x16   : > { %p485_p1 = scmp.ge.s32.totalorder %s704_s14, 1  ;;  %s133_s6 = scalar_lea.sflag [#allocation3], %s132_s25 }
  0x17   : > { %p568_p2 = pneg %p800_p0  ;;  %s579_s7 = scalar_lea.vmem %s145_s4, 128 }
  0x18   : > { %p580_p3 = scmp.ne.s32.totalorder %s145_s4, %s579_s7  ;;  %s706_s8 = smov [#allocation2]  }
  0x19   : > { %s584_s15 = sshll.u32 %s706_s8, 4  ;;  %s585_s15 = int_to_ptr.vmem [resolvable:$false] %s584_s15 }
  0x1a   : > { %p582_p5 = pnand %p580_p3, %p568_p2  ;;  %s586_s16 = scalar_lea.vmem %s585_s15, 256 }
  0x1b   : > { %p587_p7 = scmp.lt.s32.totalorder %s145_s4, %s585_s15  ;;  %p588_p10 = scmp.lt.s32.totalorder %s586_s16, %s579_s7 }
  0x1c   : > { %p583_p6 = pneg %p582_p5 }
  0x1d   : > { %p589_p12 = por %p588_p10, %p587_p7 }
  0x1f   : > { %p590_p4 = pnand %p589_p12, %p583_p6 }
  0x21   : > { %593 = shalt.err (!%p590_p4)
}
  0x22   : > { %s707_s18 = smov 64   ;;  %s708_s19 = smov 4  }
  0x23   : > { %501 = dma.hbm_to_vmem [thread:$0]  (!%p800_p0), %s143_s30, 128, %s145_s4, %s133_s6, %s707_s18, %s707_s18, %s708_s19  }
  0x24   : > { %p152_p13 = scmp.lt.s32.totalorder %s704_s14, 3 }
  0x26   : > { %p153_p2 = pnand %p485_p1, %p152_p13 }
  0x27   : > { %s813_s20 = sand.u32 (!%p153_p2), 1, %s688_s10  }
  0x28   : > { %156 = sbr.rel (%p153_p2) target bundleno = 366 (0x16e), region = 24  ;;  %s486_s25 = sshll.u32 (!%p153_p2), %s813_s20, 3 }
  0x29   : > { %s159_s26 = scalar_lea.sflag (!%p153_p2), [#allocation3], %s813_s20  ;;  %s162_s27 = scalar_lea.vmem (!%p153_p2), [#allocation2], %s486_s25 }
  0x2d   : > { %671 = dma.done.wait (%p776_p8), %s159_s26, 128  }
  0x2e   : > { %673 = vsyncadd (%p776_p8), %s159_s26, 4294967168  ;;  %vm197_vm0 = vcmask 519168   ;;  %v194_v0 = vld [vmem:[%s162_s27] sm:$0xf]  ;;  %v195_v1 = vld [vmem:[%s162_s27 + $0x4] sm:$0xf]  ;;  %v204_v11 = vlaneseq }
  0x2f   : > { %v198_v2 = vsel %vm197_vm0, %v194_v0, 0.0  ;;  %v199_v3 = vsel %vm197_vm0, %v195_v1, 0.0  ;;  %v272_v4 = vmul.f32 %v194_v0, %v194_v0  ;;  %v273_v5 = vmul.f32 %v195_v1, %v195_v1  ;;  %s822_s21 = scalar_lea.vmem [#allocation5], %s813_s20  ;;  %s834_s28 = scalar_lea.vmem [#allocation6], %s813_s20 }
  0x30   : > { %v200_v6 = vadd.f32 %v199_v3, %v198_v2  ;;  %v709_v10 = vmov 0   ;;  %v205_v12 = vshrl.u32 %v204_v11, 7  ;;  %vm191_vm1 = vcmask 24576   ;;  %s487_s29 = sshll.u32 %s696_s12, 4  ;;  %s361_s30 = sshll.u32 %s822_s21, 4  ;;  %s852_s30 = int_to_ptr.vmem [resolvable:$true] %s361_s30 }
  0x31   : > { %v274_v7 = vsel %vm197_vm0, %v272_v4, 0.0  ;;  %v275_v8 = vsel %vm197_vm0, %v273_v5, 0.0  ;;  %564 = vset.pattern.permute.xlu1 %v709_v10  ;;  %565 = vset.pattern.permute.xlu0 %v709_v10  ;;  %v248_v13 = vand.u32 127, %v204_v11  ;;  %v710_v14 = vmov 0.0   ;;  %s850_s5 = scalar_lea.hbm %s926_s1, %s487_s29  ;;  %s374_s6 = sshll.u32 %s834_s28, 4  ;;  %s375_s6 = int_to_ptr.vmem [resolvable:$true] %s374_s6 }
  0x32   : > { %201 = vadd.xlane.f32.xlu0 %v200_v6  ;;  %v276_v9 = vadd.f32 %v275_v8, %v274_v7  ;;  %192 = vst.msk [vmem:[%s822_s21] sm:$0x1] %vm191_vm1, %v710_v14  ;;  %v711_v16 = vmov 1966171168   ;;  %v206_v18 = vsub.s32 0, %v205_v12  ;;  %v210_v19 = vsub.s32 1, %v205_v12 }
  0x33   : > { %v251_v15 = vsub.s32 %v248_v13, %v205_v12  ;;  %v223_v17 = vunpack.c.l.s4 %v711_v16  ;;  %v214_v20 = vsub.s32 2, %v205_v12  ;;  %v218_v21 = vsub.s32 3, %v205_v12  ;;  %193 = vst.msk [vmem:[%s834_s28] sm:$0x1] %vm191_vm1, %v710_v14  ;;  %s345_s7 = scalar_lea.sflag [#allocation4], %s813_s20  ;;  %s594_s8 = scalar_lea.vmem %s852_s30, 16 }
  0x34   : > { %p595_p8 = scmp.ne.s32.totalorder %s852_s30, %s594_s8  ;;  %s712_s15 = smov [#allocation5]  }
  0x35   : > { %v224_v22 = vunpack.c.0.s8 %v223_v17  ;;  %s598_s16 = sshll.u32 %s712_s15, 4  ;;  %s599_s16 = int_to_ptr.vmem [resolvable:$false] %s598_s16 }
  0x36   : > { %277 = vadd.xlane.f32.xlu0 %v276_v9  ;;  %p596_p12 = pnand %p595_p8, %p780_p9  ;;  %s600_s18 = scalar_lea.vmem %s599_s16, 32 }
  0x37   : > { %v826_v28 = vsub.s32 %v224_v22, %v205_v12  ;;  %p601_p1 = scmp.lt.s32.totalorder %s852_s30, %s599_s16  ;;  %p602_p3 = scmp.lt.s32.totalorder %s600_s18, %s594_s8 }
  0x38   : > { %p597_p0 = pneg %p596_p12 }
  0x39   : > { %v196_v49 = vld [vmem:[%s822_s21] sm:$0x1]  ;;  %p603_p5 = por %p602_p3, %p601_p1 }
  0x3a   : > { %v271_v55 = vld [vmem:[%s834_s28] sm:$0x1] }
  0x3b   : > { %p604_p6 = pnand %p603_p5, %p597_p0 }
  0xbb   : > { %v202_v23 = vpop.xlane.xlu0 %201 }
  0xbc   : > { %v207_v24 = vrot.slane %v202_v23, %v206_v18  ;;  %v211_v25 = vrot.slane %v202_v23, %v210_v19  ;;  %v215_v26 = vrot.slane %v202_v23, %v214_v20  ;;  %v219_v27 = vrot.slane %v202_v23, %v218_v21 }
  0xbe   : > { %v220_v29 = vcombine.low %v207_v24, %v211_v25  ;;  %v221_v30 = vcombine.low %v215_v26, %v219_v27 }
  0xbf   : > { %v278_v31 = vpop.xlane.xlu0 %277 }
  0xc0   : > { %v283_v32 = vrot.slane %v278_v31, %v206_v18  ;;  %v287_v33 = vrot.slane %v278_v31, %v210_v19  ;;  %v291_v34 = vrot.slane %v278_v31, %v214_v20  ;;  %v295_v35 = vrot.slane %v278_v31, %v218_v21 }
  0xc1   : > { %v228_v36 = vrot.slane %v220_v29, %v826_v28  ;;  %v235_v37 = vrot.slane %v221_v30, %v826_v28 }
  0xc2   : > { %v296_v38 = vcombine.low %v283_v32, %v287_v33  ;;  %v297_v39 = vcombine.low %v291_v34, %v295_v35 }
  0xc3   : > { %v236_v40 = vcombine.low %v228_v36, %v235_v37 }
  0xc4   : > { %v304_v41 = vrot.slane %v296_v38, %v826_v28  ;;  %v311_v42 = vrot.slane %v297_v39, %v826_v28 }
  0xc5   : > { %v243_v43 = vrot.slane %v236_v40, %v826_v28 }
  0xc6   : > { %v312_v44 = vcombine.low %v304_v41, %v311_v42 }
  0xc7   : > { %245 = vperm.xlu1 %564, %v243_v43  }
  0xc8   : > { %v319_v45 = vrot.slane %v312_v44, %v826_v28 }
  0xcb   : > { %321 = vperm.xlu1 %564, %v319_v45  }
 0x142   : > { %v246_v46 = vpop.permute.xlu1 %245 }
 0x143   : > { %v252_v47 = vrot.slane %v246_v46, %v251_v15 }
 0x145   : > { %v259_v48 = vrot.slane %v252_v47, %v826_v28 }
 0x146   : > { %v322_v50 = vpop.permute.xlu1 %321 }
 0x147   : > { %v266_v51 = vrot.slane %v259_v48, %v826_v28  ;;  %v326_v52 = vrot.slane %v322_v50, %v251_v15 }
 0x149   : > { %v268_v53 = vadd.f32 %v266_v51, %v196_v49  ;;  %v333_v54 = vrot.slane %v326_v52, %v826_v28 }
 0x14b   : > { %270 = vst.msk [vmem:[%s822_s21] sm:$0x1] %vm191_vm1, %v268_v53  ;;  %v340_v56 = vrot.slane %v333_v54, %v826_v28 }
 0x14c   : > { %607 = shalt.err (!%p604_p6)
}
 0x14d   : > { %s608_s19 = scalar_lea.hbm %s850_s5, 16  ;;  %s612_s27 = scalar_lea.hbm %s926_s1, 32 }
 0x14e   : > { %p609_p7 = scmp.ne.s32.totalorder %s850_s5, %s608_s19  ;;  %p613_p13 = scmp.lt.s32.totalorder %s850_s5, %s926_s1 }
 0x14f   : > { %p614_p2 = scmp.lt.s32.totalorder %s612_s27, %s608_s19 }
 0x150   : > { %p610_p10 = pnand %p609_p7, %p780_p9 }
 0x151   : > { %p615_p8 = por %p614_p2, %p613_p13 }
 0x152   : > { %p611_p4 = pneg %p610_p10 }
 0x154   : > { %p616_p12 = pnand %p615_p8, %p611_p4 }
 0x156   : > { %619 = shalt.err (!%p616_p12)
}
 0x157   : > { %494 = dma.vmem_to_hbm [thread:$0]  (%p780_p9), %s852_s30, 16, %s850_s5, %s345_s7   ;;  %v342_v57 = vadd.f32 %v340_v56, %v271_v55 }
 0x158   : > { %s372_s15 = scalar_lea.hbm %s927_s2, %s487_s29  ;;  %s349_s16 = scalar_lea.sflag [#allocation7], %s813_s20 }
 0x159   : > { %343 = vst.msk [vmem:[%s834_s28] sm:$0x1] %vm191_vm1, %v342_v57  ;;  %s620_s18 = scalar_lea.vmem %s375_s6, 16  ;;  %s713_s19 = smov [#allocation6]  }
 0x15a   : > { %p621_p0 = scmp.ne.s32.totalorder %s375_s6, %s620_s18  ;;  %s624_s25 = sshll.u32 %s713_s19, 4  ;;  %s625_s25 = int_to_ptr.vmem [resolvable:$false] %s624_s25 }
 0x15b   : > { %s626_s30 = scalar_lea.vmem %s625_s25, 32  ;;  %p627_p5 = scmp.lt.s32.totalorder %s375_s6, %s625_s25 }
 0x15c   : > { %p622_p1 = pnand %p621_p0, %p780_p9  ;;  %p628_p6 = scmp.lt.s32.totalorder %s626_s30, %s620_s18 }
 0x15e   : > { %p623_p3 = pneg %p622_p1  ;;  %p629_p7 = por %p628_p6, %p627_p5 }
 0x160   : > { %p630_p10 = pnand %p629_p7, %p623_p3 }
 0x162   : > { %633 = shalt.err (!%p630_p10)
}
 0x163   : > { %s634_s12 = scalar_lea.hbm %s372_s15, 16  ;;  %s638_s29 = scalar_lea.hbm %s927_s2, 32 }
 0x164   : > { %p635_p4 = scmp.ne.s32.totalorder %s372_s15, %s634_s12  ;;  %p639_p8 = scmp.lt.s32.totalorder %s372_s15, %s927_s2 }
 0x165   : > { %p640_p12 = scmp.lt.s32.totalorder %s638_s29, %s634_s12 }
 0x166   : > { %p636_p13 = pnand %p635_p4, %p780_p9 }
 0x167   : > { %p641_p0 = por %p640_p12, %p639_p8 }
 0x168   : > { %p637_p2 = pneg %p636_p13 }
 0x16a   : > { %p642_p1 = pnand %p641_p0, %p637_p2 }
 0x16c   : > { %645 = shalt.err (!%p642_p1)
}
 0x16d   : > { %495 = dma.vmem_to_hbm [thread:$0]  (%p780_p9), %s375_s6, 16, %s372_s15, %s349_s16  }
 0x16e PF: > { %s386_s26 = sand.u32 1, %s684_s9   ;;  %p933_p3 = scmp.ge.s32.totalorder %s704_s14, 2 }
 0x16f   : > { %s387_s27 = scalar_lea.sflag [#allocation4], %s386_s26 }
 0x170   : > { %p503_p5 = pnand %p933_p3, %p787_p11 }
 0x172   : > { %p504_p6 = pneg %p503_p5 }
 0x174   : > { %675 = dma.done.wait (%p504_p6), %s387_s27, 16  }
 0x175   : > { %677 = vsyncadd (%p504_p6), %s387_s27, 4294967280  ;;  %s395_s21 = scalar_lea.sflag [#allocation7], %s386_s26 }
 0x176   : > { %679 = dma.done.wait (%p504_p6), %s395_s21, 16  }
 0x177   : > { %681 = vsyncadd (%p504_p6), %s395_s21, 4294967280  ;;  %s22_s14 = sadd.s32 1, %s704_s14   ;;  %s934_s9 = smov %s688_s10 }
 0x178   : > { %p19_p7 = scmp.ge.s32.totalorder %s22_s14, 4   ;;  %s935_s10 = smov %s692_s11 }
 0x179   : > { %s936_s11 = smov %s785_s23  ;;  %s937_s12 = smov %s700_s13 }
 0x17a   : > { %s938_s13 = smov %s940_s17  ;;  %21 = sbr.rel (!%p19_p7) target bundleno = 8 (0x8), region = 90 }
 0x17f   :  { %399 = vsyncpa [#allocation3], 1 }
 0x180   :  { %401 = vsyncpa [#allocation3 + $0x1], 1 }
 0x181   :  { %402 = vsyncpa [#allocation4], 1 }
 0x182   :  { %404 = vsyncpa [#allocation4 + $0x1], 1 }
 0x183   :  { %405 = vsyncpa [#allocation7], 1 }
 0x184   :  { %407 = vsyncpa [#allocation7 + $0x1], 1 }

</bundles_post_ra>
